<compile_context>
chip_gen: v6e
topology: v6e:2x2x1
jax: 0.10.0
libtpu: 0.0.40
codegen_flags: <defaults>
</compile_context>

<pallas_src>
import functools

import jax
import jax.numpy as jnp
from jax.experimental import pallas as pl
from jax.experimental.pallas import tpu as pltpu


def _round_up(x, m):
    return ((x + m - 1) // m) * m


def _concat_fusion_kernel(num_modalities, *refs):
    """refs = (x_0..x_{m-1}, w_0..w_{m-1}, bias, out).

    One grid step computes one (tm, tn) output tile:
        out_tile = sum_i x_i_tile @ w_i_tile + bias_tile
    which equals concat(x_0..x_{m-1}, axis=1) @ W + b for that tile.
    """
    m = num_modalities
    x_refs = refs[:m]
    w_refs = refs[m:2 * m]
    b_ref = refs[2 * m]
    out_ref = refs[2 * m + 1]

    acc = jnp.dot(x_refs[0][...], w_refs[0][...],
                  preferred_element_type=jnp.float32)
    for i in range(1, m):
        acc = acc + jnp.dot(x_refs[i][...], w_refs[i][...],
                            preferred_element_type=jnp.float32)
    acc = acc + b_ref[...].astype(jnp.float32)   # (1, tn) broadcasts over rows
    out_ref[...] = acc.astype(out_ref.dtype)


def concat_fusion(inputs, weight, bias, *, compute_dtype=None):
    """Pallas equivalent of ConcatFusion.forward.

    inputs : list of (B, D_i) arrays (2 or 3 modalities)
    weight : (input_dim, output_dim) with input_dim == sum(D_i)
             (transposed vs. torch's (out, in) layout)
    bias   : (output_dim,)
    returns: (B, output_dim)
    """
    m = len(inputs)
    split_sizes = tuple(int(x.shape[1]) for x in inputs)
    B = int(inputs[0].shape[0])
    input_dim, output_dim = (int(s) for s in weight.shape)
    assert sum(split_sizes) == input_dim

    out_dtype = inputs[0].dtype

    # ---- lane-dense output: pad N to a multiple of 128 with zero columns ----
    n_pad = _round_up(output_dim, 128)
    if n_pad != output_dim:
        weight = jnp.pad(weight, ((0, 0), (0, n_pad - output_dim)))
        bias = jnp.pad(bias, (0, n_pad - output_dim))
    bias2d = bias.reshape(1, n_pad)

    # ---- pre-split the weight per modality (contiguous DMA per operand) ----
    w_parts = []
    off = 0
    for d in split_sizes:
        w_parts.append(weight[off:off + d, :])
        off += d

    # Optional reduced-precision compute (v6e/v7x): halves dominant W traffic.
    if compute_dtype is not None:
        inputs = [x.astype(compute_dtype) for x in inputs]
        w_parts = [w.astype(compute_dtype) for w in w_parts]

    # ---- tile sizes ----
    # Batch tile: whole batch when small (block == full dim is always legal);
    # otherwise 256 rows toward the 256-wide MXU on v6e/v7x.
    tm = B if B <= 256 else 256
    # Output-column tile: lane-dense multiple of 128.
    tn = 256 if (n_pad % 256 == 0 and n_pad >= 256) else 128

    grid = (pl.cdiv(B, tm), pl.cdiv(n_pad, tn))

    in_specs = []
    for d in split_sizes:                                   # activations
        in_specs.append(pl.BlockSpec((tm, d), lambda mi, nj: (mi, 0)))
    for d in split_sizes:                                   # weight columns
        in_specs.append(pl.BlockSpec((d, tn), lambda mi, nj: (0, nj)))
    in_specs.append(pl.BlockSpec((1, tn), lambda mi, nj: (0, nj)))   # bias
    out_specs = pl.BlockSpec((tm, tn), lambda mi, nj: (mi, nj))

    # ---- VMEM budget (double-buffered tiles) & cost estimate ----
    in_item = jnp.dtype(inputs[0].dtype).itemsize
    w_item = jnp.dtype(w_parts[0].dtype).itemsize
    b_item = jnp.dtype(bias2d.dtype).itemsize
    out_item = jnp.dtype(out_dtype).itemsize
    tile_bytes = (sum(tm * d for d in split_sizes) * in_item
                  + input_dim * tn * w_item
                  + tn * b_item
                  + tm * tn * out_item)
    vmem_limit = int(min(64 * 1024 * 1024,
                         max(8 * 1024 * 1024, 3 * tile_bytes)))

    cost = pl.CostEstimate(
        flops=2 * B * input_dim * n_pad,
        transcendentals=0,
        bytes_accessed=(B * input_dim * in_item
                        + input_dim * n_pad * w_item
                        + n_pad * b_item
                        + B * n_pad * out_item),
    )

    kernel = functools.partial(_concat_fusion_kernel, m)

    out_padded = pl.pallas_call(
        kernel,
        out_shape=jax.ShapeDtypeStruct((B, n_pad), out_dtype),
        grid_spec=pltpu.PrefetchScalarGridSpec(
            num_scalar_prefetch=0,
            grid=grid,
            in_specs=in_specs,
            out_specs=out_specs,
        ),
        compiler_params=pltpu.CompilerParams(
            dimension_semantics=("parallel", "parallel"),
            vmem_limit_bytes=vmem_limit,
        ),
        cost_estimate=cost,
    )(*inputs, *w_parts, bias2d)

    if n_pad != output_dim:
        out_padded = out_padded[:, :output_dim]
    return out_padded


class ConcatFusionPallas:
    """Mirror of the PyTorch ConcatFusion module (forward only)."""

    def __init__(self, len_modals, input_dim=1024, output_dim=100, key=None,
                 compute_dtype=None):
        self.len_modals = len_modals
        self.input_dim = input_dim
        self.output_dim = output_dim
        self.compute_dtype = compute_dtype
        if key is None:
            key = jax.random.PRNGKey(0)
        kw, kb = jax.random.split(key)
        # nn.Linear default init: U(-1/sqrt(fan_in), 1/sqrt(fan_in)).
        bound = 1.0 / (input_dim ** 0.5)
        # torch weight is (out, in); we store (in, out) — see layout comment.
        self.weight = jax.random.uniform(
            kw, (input_dim, output_dim), jnp.float32, -bound, bound)
        self.bias = jax.random.uniform(
            kb, (output_dim,), jnp.float32, -bound, bound)

    def __call__(self, x, y, z):
        if self.len_modals == 2:
            return concat_fusion([x, y], self.weight, self.bias,
                                 compute_dtype=self.compute_dtype)
        if self.len_modals == 3:
            return concat_fusion([x, y, z], self.weight, self.bias,
                                 compute_dtype=self.compute_dtype)
        raise ValueError("len_modals must be 2 or 3")


if __name__ == "__main__":
    key = jax.random.PRNGKey(0)
    k1, k2, k3, kp1, kp2, kp3 = jax.random.split(key, 6)

    # Small shapes consistent with the module: batch=8, 128 features per
    # modality, 3 modalities (input_dim=384), module-default output_dim=100
    # (exercises the lane-dense padding path 100 -> 128).
    B, D = 8, 128
    x = jax.random.normal(k1, (B, D), jnp.float32)
    y = jax.random.normal(k2, (B, D), jnp.float32)
    z = jax.random.normal(k3, (B, D), jnp.float32)

    # --- 3-modality path, output_dim=100 (padded to 128 internally) ---
    model3 = ConcatFusionPallas(3, input_dim=3 * D, output_dim=100, key=kp1)
    out3 = jax.block_until_ready(model3(x, y, z))
    ref3 = jnp.concatenate([x, y, z], axis=1) @ model3.weight + model3.bias
    assert out3.shape == (B, 100)
    assert jnp.allclose(out3, ref3, atol=2e-4, rtol=2e-4), "mismatch (3 modals)"

    # --- 2-modality path, lane-dense output_dim=128 (no padding needed) ---
    model2 = ConcatFusionPallas(2, input_dim=2 * D, output_dim=128, key=kp2)
    out2 = jax.block_until_ready(model2(x, y, z))
    ref2 = jnp.concatenate([x, y], axis=1) @ model2.weight + model2.bias
    assert out2.shape == (B, 128)
    assert jnp.allclose(out2, ref2, atol=2e-4, rtol=2e-4), "mismatch (2 modals)"

    # --- multi-column-tile grid: output_dim=320 -> padded 384, grid (1, 3) ---
    model_wide = ConcatFusionPallas(3, input_dim=3 * D, output_dim=320, key=kp3)
    out_w = jax.block_until_ready(model_wide(x, y, z))
    ref_w = jnp.concatenate([x, y, z], axis=1) @ model_wide.weight + model_wide.bias
    assert out_w.shape == (B, 320)
    assert jnp.allclose(out_w, ref_w, atol=2e-4, rtol=2e-4), "mismatch (wide N)"

    print("KERNEL_OK")
</pallas_src>

<mosaic_0001>
module attributes {stable_mosaic.version = 11 : i64} {
  func.func @_concat_fusion_kernel(%arg0: i32, %arg1: i32, %arg2: memref<8x128xf32, #tpu.memory_space<vmem>>, %arg3: memref<8x128xf32, #tpu.memory_space<vmem>>, %arg4: memref<8x128xf32, #tpu.memory_space<vmem>>, %arg5: memref<128x128xf32, #tpu.memory_space<vmem>>, %arg6: memref<128x128xf32, #tpu.memory_space<vmem>>, %arg7: memref<128x128xf32, #tpu.memory_space<vmem>>, %arg8: memref<1x128xf32, #tpu.memory_space<vmem>>, %arg9: memref<8x128xf32, #tpu.memory_space<vmem>>) attributes {dimension_semantics = [#tpu.dimension_semantics<parallel>, #tpu.dimension_semantics<parallel>], iteration_bounds = array<i64: 1, 1>, scalar_prefetch = 0 : i64, scratch_operands = 0 : i64, tpu.core_type = #tpu.core_type<tc>, window_params = [{transform_indices = @transform_0, window_bounds = array<i64: 8, 128>}, {transform_indices = @transform_1, window_bounds = array<i64: 8, 128>}, {transform_indices = @transform_2, window_bounds = array<i64: 8, 128>}, {transform_indices = @transform_3, window_bounds = array<i64: 128, 128>}, {transform_indices = @transform_4, window_bounds = array<i64: 128, 128>}, {transform_indices = @transform_5, window_bounds = array<i64: 128, 128>}, {transform_indices = @transform_6, window_bounds = array<i64: 1, 128>}, {transform_indices = @transform_7, window_bounds = array<i64: 8, 128>}]} {
    %c0 = arith.constant 0 : index
    %c0_0 = arith.constant 0 : index
    %0 = vector.load %arg2[%c0, %c0_0] : memref<8x128xf32, #tpu.memory_space<vmem>>, vector<8x128xf32>
    %c0_1 = arith.constant 0 : index
    %c0_2 = arith.constant 0 : index
    %1 = vector.load %arg5[%c0_1, %c0_2] : memref<128x128xf32, #tpu.memory_space<vmem>>, vector<128x128xf32>
    %cst = arith.constant dense<0.000000e+00> : vector<8x128xf32>
    %2 = tpu.matmul %0, %1, %cst {dimension_numbers = #tpu.dot_dimension_numbers<[1], [0], [0], [1], [0, 0, 1, 1], [], []>} : vector<8x128xf32>, vector<128x128xf32>, vector<8x128xf32> -> vector<8x128xf32>
    %c0_3 = arith.constant 0 : index
    %c0_4 = arith.constant 0 : index
    %3 = vector.load %arg3[%c0_3, %c0_4] : memref<8x128xf32, #tpu.memory_space<vmem>>, vector<8x128xf32>
    %c0_5 = arith.constant 0 : index
    %c0_6 = arith.constant 0 : index
    %4 = vector.load %arg6[%c0_5, %c0_6] : memref<128x128xf32, #tpu.memory_space<vmem>>, vector<128x128xf32>
    %cst_7 = arith.constant dense<0.000000e+00> : vector<8x128xf32>
    %5 = tpu.matmul %3, %4, %cst_7 {dimension_numbers = #tpu.dot_dimension_numbers<[1], [0], [0], [1], [0, 0, 1, 1], [], []>} : vector<8x128xf32>, vector<128x128xf32>, vector<8x128xf32> -> vector<8x128xf32>
    %6 = arith.addf %2, %5 : vector<8x128xf32>
    %c0_8 = arith.constant 0 : index
    %c0_9 = arith.constant 0 : index
    %7 = vector.load %arg4[%c0_8, %c0_9] : memref<8x128xf32, #tpu.memory_space<vmem>>, vector<8x128xf32>
    %c0_10 = arith.constant 0 : index
    %c0_11 = arith.constant 0 : index
    %8 = vector.load %arg7[%c0_10, %c0_11] : memref<128x128xf32, #tpu.memory_space<vmem>>, vector<128x128xf32>
    %cst_12 = arith.constant dense<0.000000e+00> : vector<8x128xf32>
    %9 = tpu.matmul %7, %8, %cst_12 {dimension_numbers = #tpu.dot_dimension_numbers<[1], [0], [0], [1], [0, 0, 1, 1], [], []>} : vector<8x128xf32>, vector<128x128xf32>, vector<8x128xf32> -> vector<8x128xf32>
    %10 = arith.addf %6, %9 : vector<8x128xf32>
    %c0_13 = arith.constant 0 : index
    %c0_14 = arith.constant 0 : index
    %11 = vector.load %arg8[%c0_13, %c0_14] : memref<1x128xf32, #tpu.memory_space<vmem>>, vector<1x128xf32>
    %12 = vector.broadcast %11 : vector<1x128xf32> to vector<8x128xf32>
    %13 = arith.addf %10, %12 : vector<8x128xf32>
    %c0_15 = arith.constant 0 : index
    %c0_16 = arith.constant 0 : index
    %14 = vector.load %arg9[%c0_15, %c0_16] : memref<8x128xf32, #tpu.memory_space<vmem>>, vector<8x128xf32>
    tpu.vector_store %arg9[%c0_15, %c0_16], %13 {strides = array<i32>} : memref<8x128xf32, #tpu.memory_space<vmem>>, vector<8x128xf32>,
    return
  }
  func.func @transform_0(%arg0: i32, %arg1: i32) -> (i32, i32) {
    %c0_i32 = arith.constant 0 : i32
    %c0_i32_0 = arith.constant 0 : i32
    return %arg0, %c0_i32 : i32, i32
  }
  func.func @transform_1(%arg0: i32, %arg1: i32) -> (i32, i32) {
    %c0_i32 = arith.constant 0 : i32
    %c0_i32_0 = arith.constant 0 : i32
    return %arg0, %c0_i32 : i32, i32
  }
  func.func @transform_2(%arg0: i32, %arg1: i32) -> (i32, i32) {
    %c0_i32 = arith.constant 0 : i32
    %c0_i32_0 = arith.constant 0 : i32
    return %arg0, %c0_i32 : i32, i32
  }
  func.func @transform_3(%arg0: i32, %arg1: i32) -> (i32, i32) {
    %c0_i32 = arith.constant 0 : i32
    %c0_i32_0 = arith.constant 0 : i32
    return %c0_i32, %arg1 : i32, i32
  }
  func.func @transform_4(%arg0: i32, %arg1: i32) -> (i32, i32) {
    %c0_i32 = arith.constant 0 : i32
    %c0_i32_0 = arith.constant 0 : i32
    return %c0_i32, %arg1 : i32, i32
  }
  func.func @transform_5(%arg0: i32, %arg1: i32) -> (i32, i32) {
    %c0_i32 = arith.constant 0 : i32
    %c0_i32_0 = arith.constant 0 : i32
    return %c0_i32, %arg1 : i32, i32
  }
  func.func @transform_6(%arg0: i32, %arg1: i32) -> (i32, i32) {
    %c0_i32 = arith.constant 0 : i32
    %c0_i32_0 = arith.constant 0 : i32
    return %c0_i32, %arg1 : i32, i32
  }
  func.func @transform_7(%arg0: i32, %arg1: i32) -> (i32, i32) {
    %c0_i32 = arith.constant 0 : i32
    return %arg0, %arg1 : i32, i32
  }
}

</mosaic_0001>

<bundles_post_ra>
// kernel: tpu_custom_call.1
= control target key start
LH: loop header
LB: loop body
LE: loop exit
PB: predicated region body
PF: predicated region fallthrough
CT: control target
= control target key end

     0   :  { %12 = vsyncpa [#allocation3], 0  ;;  %s848_s0 = inlined_call_operand.hbm [shape: f32[8,128], index: 0, kind: input, shape index: {}]   ;;  %s849_s1 = inlined_call_operand.hbm [shape: f32[8,128], index: 1, kind: input, shape index: {}]   ;;  %s850_s2 = inlined_call_operand.hbm [shape: f32[8,128], index: 2, kind: input, shape index: {}]   ;;  %s851_s3 = inlined_call_operand.hbm [shape: f32[128,128], index: 3, kind: input, shape index: {}]   ;;  %s852_s4 = inlined_call_operand.hbm [shape: f32[128,128], index: 4, kind: input, shape index: {}]   ;;  %s853_s5 = inlined_call_operand.hbm [shape: f32[128,128], index: 5, kind: input, shape index: {}]   ;;  %s854_s6 = inlined_call_operand.vmem [shape: f32[1,128], index: 6, kind: input, shape index: {}]   ;;  %s855_s7 = inlined_call_operand.hbm [shape: f32[8,128], index: 7, kind: output, shape index: {}]  }
   0x1   :  { %13 = vsyncpa [#allocation6], 0 }
   0x2   :  { %14 = vsyncpa [#allocation9], 0 }
   0x3   :  { %15 = vsyncpa [#allocation12], 0 }
   0x4   :  { %16 = vsyncpa [#allocation4], 0  ;;  %s710_s24 = smov [#allocation5]   ;;  %s711_s26 = smov [#allocation8]  }
   0x5   :  { %s33_s25 = sshll.u32 %s710_s24, 4  ;;  %s52_s27 = sshll.u32 %s711_s26, 4  ;;  %s34_s25 = int_to_ptr.vmem [resolvable:$true] %s33_s25  ;;  %s53_s27 = int_to_ptr.vmem [resolvable:$true] %s52_s27 }
   0x6   :  { %s568_s28 = scalar_lea.vmem %s34_s25, 128  ;;  %p573_p1 = scmp.lt.s32.totalorder %s34_s25, %s34_s25 }
   0x7   :  { %p569_p0 = scmp.ne.s32.totalorder %s34_s25, %s568_s28  ;;  %p574_p2 = scmp.lt.s32.totalorder %s568_s28, %s568_s28 }
   0x9   :  { %p575_p3 = por %p574_p2, %p573_p1 }
   0xb   :  { %p576_p4 = pnand %p575_p3, %p569_p0 }
   0xd   :  { %579 = shalt.err (!%p576_p4)
}
   0xe   :  { %36 = dma.hbm_to_vmem [thread:$0]  %s849_s1, 128, %s34_s25, [#allocation6]  }
   0xf   :  { %s588_s8 = scalar_lea.vmem %s53_s27, 2048  ;;  %p593_p6 = scmp.lt.s32.totalorder %s53_s27, %s53_s27 }
  0x10   :  { %p589_p5 = scmp.ne.s32.totalorder %s53_s27, %s588_s8  ;;  %p594_p7 = scmp.lt.s32.totalorder %s588_s8, %s588_s8 }
  0x12   :  { %p595_p8 = por %p594_p7, %p593_p6 }
  0x14   :  { %p596_p9 = pnand %p595_p8, %p589_p5 }
  0x16   :  { %599 = shalt.err (!%p596_p9)
}
  0x17   :  { %s712_s9 = smov 128   ;;  %s713_s10 = smov 8  }
  0x18   :  { %58 = dma.hbm_to_vmem [thread:$0]  %s851_s3, 2048, %s53_s27, [#allocation9], %s712_s9, %s712_s9, %s713_s10  }
  0x19   :  { %s714_s13 = smov [#allocation2]   ;;  %s715_s15 = smov [#allocation7]  }
  0x1a   :  { %s23_s14 = sshll.u32 %s714_s13, 4  ;;  %s43_s1 = sshll.u32 %s715_s15, 4  ;;  %s24_s14 = int_to_ptr.vmem [resolvable:$true] %s23_s14  ;;  %s44_s1 = int_to_ptr.vmem [resolvable:$true] %s43_s1 }
  0x1b   :  { %s608_s16 = scalar_lea.vmem %s24_s14, 128  ;;  %p613_p11 = scmp.lt.s32.totalorder %s24_s14, %s24_s14 }
  0x1c   :  { %p609_p10 = scmp.ne.s32.totalorder %s24_s14, %s608_s16  ;;  %p614_p12 = scmp.lt.s32.totalorder %s608_s16, %s608_s16 }
  0x1e   :  { %p615_p13 = por %p614_p12, %p613_p11 }
  0x20   :  { %p616_p0 = pnand %p615_p13, %p609_p10 }
  0x22   :  { %619 = shalt.err (!%p616_p0)
}
  0x23   :  { %26 = dma.hbm_to_vmem [thread:$0]  %s848_s0, 128, %s24_s14, [#allocation3]  }
  0x24   :  { %s628_s19 = scalar_lea.vmem %s44_s1, 128  ;;  %p633_p2 = scmp.lt.s32.totalorder %s44_s1, %s44_s1 }
  0x25   :  { %p629_p1 = scmp.ne.s32.totalorder %s44_s1, %s628_s19  ;;  %p634_p3 = scmp.lt.s32.totalorder %s628_s19, %s628_s19 }
  0x27   :  { %p635_p4 = por %p634_p3, %p633_p2 }
  0x29   :  { %p636_p5 = pnand %p635_p4, %p629_p1 }
  0x2b   :  { %639 = shalt.err (!%p636_p5)
}
  0x2c   :  { %46 = dma.hbm_to_vmem [thread:$0]  %s850_s2, 128, %s44_s1, [#allocation6]  }
  0x2d   :  { %s716_s21 = smov [#allocation10]   ;;  %s717_s23 = smov [#allocation11]  }
  0x2e   :  { %s64_s22 = sshll.u32 %s716_s21, 4  ;;  %s76_s24 = sshll.u32 %s717_s23, 4  ;;  %s65_s22 = int_to_ptr.vmem [resolvable:$true] %s64_s22  ;;  %s77_s24 = int_to_ptr.vmem [resolvable:$true] %s76_s24 }
  0x2f   :  { %s648_s25 = scalar_lea.vmem %s65_s22, 2048  ;;  %p653_p7 = scmp.lt.s32.totalorder %s65_s22, %s65_s22 }
  0x30   :  { %p649_p6 = scmp.ne.s32.totalorder %s65_s22, %s648_s25  ;;  %p654_p8 = scmp.lt.s32.totalorder %s648_s25, %s648_s25 }
  0x32   :  { %p655_p9 = por %p654_p8, %p653_p7 }
  0x34   :  { %p656_p10 = pnand %p655_p9, %p649_p6 }
  0x36   :  { %659 = shalt.err (!%p656_p10)
}
  0x37   :  { %70 = dma.hbm_to_vmem [thread:$0]  %s852_s4, 2048, %s65_s22, [#allocation9], %s712_s9, %s712_s9, %s713_s10  }
  0x38   :  { %s668_s2 = scalar_lea.vmem %s77_s24, 2048  ;;  %p673_p12 = scmp.lt.s32.totalorder %s77_s24, %s77_s24 }
  0x39   :  { %p669_p11 = scmp.ne.s32.totalorder %s77_s24, %s668_s2  ;;  %p674_p13 = scmp.lt.s32.totalorder %s668_s2, %s668_s2 }
  0x3b   :  { %p675_p0 = por %p674_p13, %p673_p12 }
  0x3d   :  { %p676_p1 = pnand %p675_p0, %p669_p11 }
  0x3f   :  { %679 = shalt.err (!%p676_p1)
}
  0x40   :  { %82 = dma.hbm_to_vmem [thread:$0]  %s853_s5, 2048, %s77_s24, [#allocation12], %s712_s9, %s712_s9, %s713_s10  }
  0x41   :  { %700 = dma.done.wait [#allocation3], 128  }
  0x42   :  { %701 = vsyncadd [#allocation3], 4294967168 }
  0x43   :  { %702 = dma.done.wait [#allocation6], 256  }
  0x44   :  { %703 = vsyncadd [#allocation6], 4294967040 }
  0x45   :  { %704 = dma.done.wait [#allocation9], 4096  }
  0x46   :  { %705 = vsyncadd [#allocation9], 4294963200 }
  0x47   :  { %706 = dma.done.wait [#allocation12], 2048  }
  0x48   :  { %707 = vsyncadd [#allocation12], 4294965248  ;;  %v718_v0 = vmov 0.0   ;;  %vm719_vm0 = vmmov 0   ;;  %v136_v1 = vld [vmem:[#allocation10 + $0x78] sm:$0xff]  ;;  %v135_v3 = vld [vmem:[#allocation10 + $0x70] sm:$0xff] }
  0x49   :  { %444 = vmatprep.subr.mxu0 %v718_v0  ;;  %479 = vmatprep.subr.mxu1 %v718_v0  ;;  %v119_v2 = vld [vmem:[#allocation8 + $0x78] sm:$0xff]  ;;  %v118_v4 = vld [vmem:[#allocation8 + $0x70] sm:$0xff]  ;;  %v134_v5 = vld [vmem:[#allocation10 + $0x68] sm:$0xff]  ;;  %s720_s29 = smov [#allocation13]  }
  0x4a   :  { %476 = vmatprep.mubr.msk.f32.mxu0 %vm719_vm0, %v718_v0  ;;  %511 = vmatprep.mubr.msk.f32.mxu1 %vm719_vm0, %v718_v0  ;;  %v117_v6 = vld [vmem:[#allocation8 + $0x68] sm:$0xff]  ;;  %v133_v7 = vld [vmem:[#allocation10 + $0x60] sm:$0xff]  ;;  %v132_v9 = vld [vmem:[#allocation10 + $0x58] sm:$0xff]  ;;  %s380_s30 = sshll.u32 %s720_s29, 4  ;;  %s381_s30 = int_to_ptr.vmem [resolvable:$true] %s380_s30 }
  0x4b   :  { %445 = vmatpush3.msra.mxu0 %v136_v1  ;;  %480 = vmatpush3.msra.mxu1 %v119_v2  ;;  %v116_v8 = vld [vmem:[#allocation8 + $0x60] sm:$0xff]  ;;  %v115_v10 = vld [vmem:[#allocation8 + $0x58] sm:$0xff]  ;;  %v131_v11 = vld [vmem:[#allocation10 + $0x50] sm:$0xff]  ;;  %s680_s8 = scalar_lea.vmem %s381_s30, 128  ;;  %p685_p3 = scmp.lt.s32.totalorder %s381_s30, %s381_s30 }
  0x4c   :  { %446 = vmatprep.subr.mxu0 %v718_v0  ;;  %481 = vmatprep.subr.mxu1 %v718_v0  ;;  %v114_v12 = vld [vmem:[#allocation8 + $0x50] sm:$0xff]  ;;  %v130_v13 = vld [vmem:[#allocation10 + $0x48] sm:$0xff]  ;;  %v129_v15 = vld [vmem:[#allocation10 + $0x40] sm:$0xff]  ;;  %p681_p2 = scmp.ne.s32.totalorder %s381_s30, %s680_s8  ;;  %p686_p4 = scmp.lt.s32.totalorder %s680_s8, %s680_s8 }
  0x4d   :  { %447 = vmatpush3.msra.mxu0 %v135_v3  ;;  %482 = vmatpush3.msra.mxu1 %v118_v4  ;;  %v113_v14 = vld [vmem:[#allocation8 + $0x48] sm:$0xff]  ;;  %v112_v16 = vld [vmem:[#allocation8 + $0x40] sm:$0xff]  ;;  %v128_v17 = vld [vmem:[#allocation10 + $0x38] sm:$0xff] }
  0x4e   :  { %448 = vmatprep.subr.mxu0 %v718_v0  ;;  %483 = vmatprep.subr.mxu1 %v718_v0  ;;  %v111_v18 = vld [vmem:[#allocation8 + $0x38] sm:$0xff]  ;;  %v127_v19 = vld [vmem:[#allocation10 + $0x30] sm:$0xff]  ;;  %v126_v21 = vld [vmem:[#allocation10 + $0x28] sm:$0xff]  ;;  %p687_p5 = por %p686_p4, %p685_p3 }
  0x4f   :  { %449 = vmatpush3.msra.mxu0 %v134_v5  ;;  %484 = vmatpush3.msra.mxu1 %v117_v6  ;;  %v110_v20 = vld [vmem:[#allocation8 + $0x30] sm:$0xff]  ;;  %v109_v22 = vld [vmem:[#allocation8 + $0x28] sm:$0xff]  ;;  %v125_v23 = vld [vmem:[#allocation10 + $0x20] sm:$0xff] }
  0x50   :  { %450 = vmatprep.subr.mxu0 %v718_v0  ;;  %485 = vmatprep.subr.mxu1 %v718_v0  ;;  %v108_v24 = vld [vmem:[#allocation8 + $0x20] sm:$0xff]  ;;  %v124_v25 = vld [vmem:[#allocation10 + $0x18] sm:$0xff]  ;;  %v123_v27 = vld [vmem:[#allocation10 + $0x10] sm:$0xff]  ;;  %p688_p6 = pnand %p687_p5, %p681_p2 }
  0x51   :  { %451 = vmatpush3.msra.mxu0 %v133_v7  ;;  %486 = vmatpush3.msra.mxu1 %v116_v8  ;;  %v107_v26 = vld [vmem:[#allocation8 + $0x18] sm:$0xff]  ;;  %v106_v28 = vld [vmem:[#allocation8 + $0x10] sm:$0xff]  ;;  %v122_v29 = vld [vmem:[#allocation10 + $0x8] sm:$0xff] }
  0x52   :  { %452 = vmatprep.subr.mxu0 %v718_v0  ;;  %487 = vmatprep.subr.mxu1 %v718_v0  ;;  %v105_v30 = vld [vmem:[#allocation8 + $0x8] sm:$0xff]  ;;  %v121_v31 = vld [vmem:[#allocation10] sm:$0xff]  ;;  %v120_v33 = vld [vmem:[#allocation5] sm:$0xff] }
  0x53   :  { %453 = vmatpush3.msra.mxu0 %v132_v9  ;;  %488 = vmatpush3.msra.mxu1 %v115_v10  ;;  %v104_v32 = vld [vmem:[#allocation8] sm:$0xff]  ;;  %v103_v34 = vld [vmem:[#allocation2] sm:$0xff]  ;;  %v293_v35 = vld [vmem:[#allocation11 + $0x78] sm:$0xff] }
  0x54   :  { %454 = vmatprep.subr.mxu0 %v718_v0  ;;  %489 = vmatprep.subr.mxu1 %v718_v0  ;;  %v292_v36 = vld [vmem:[#allocation11 + $0x70] sm:$0xff]  ;;  %v291_v37 = vld [vmem:[#allocation11 + $0x68] sm:$0xff]  ;;  %v290_v38 = vld [vmem:[#allocation11 + $0x60] sm:$0xff] }
  0x55   :  { %455 = vmatpush3.msra.mxu0 %v131_v11  ;;  %490 = vmatpush3.msra.mxu1 %v114_v12  ;;  %v289_v39 = vld [vmem:[#allocation11 + $0x58] sm:$0xff]  ;;  %v288_v40 = vld [vmem:[#allocation11 + $0x50] sm:$0xff]  ;;  %v287_v41 = vld [vmem:[#allocation11 + $0x48] sm:$0xff] }
  0x56   :  { %456 = vmatprep.subr.mxu0 %v718_v0  ;;  %491 = vmatprep.subr.mxu1 %v718_v0  ;;  %v286_v42 = vld [vmem:[#allocation11 + $0x40] sm:$0xff]  ;;  %v285_v43 = vld [vmem:[#allocation11 + $0x38] sm:$0xff]  ;;  %v284_v44 = vld [vmem:[#allocation11 + $0x30] sm:$0xff] }
  0x57   :  { %457 = vmatpush3.msra.mxu0 %v130_v13  ;;  %492 = vmatpush3.msra.mxu1 %v113_v14  ;;  %v283_v45 = vld [vmem:[#allocation11 + $0x28] sm:$0xff]  ;;  %v282_v46 = vld [vmem:[#allocation11 + $0x20] sm:$0xff]  ;;  %v281_v47 = vld [vmem:[#allocation11 + $0x18] sm:$0xff] }
  0x58   :  { %458 = vmatprep.subr.mxu0 %v718_v0  ;;  %493 = vmatprep.subr.mxu1 %v718_v0  ;;  %v280_v48 = vld [vmem:[#allocation11 + $0x10] sm:$0xff]  ;;  %v279_v49 = vld [vmem:[#allocation11 + $0x8] sm:$0xff]  ;;  %v278_v50 = vld [vmem:[#allocation11] sm:$0xff] }
  0x59   :  { %459 = vmatpush3.msra.mxu0 %v129_v15  ;;  %494 = vmatpush3.msra.mxu1 %v112_v16  ;;  %v277_v51 = vld [vmem:[#allocation7] sm:$0xff]  ;;  %v392_v58 = vld [vmem:[%s854_s6] ss:$0 sm:$0xff] }
  0x5a   :  { %460 = vmatprep.subr.mxu0 %v718_v0  ;;  %495 = vmatprep.subr.mxu1 %v718_v0 }
  0x5b   :  { %461 = vmatpush3.msra.mxu0 %v128_v17  ;;  %496 = vmatpush3.msra.mxu1 %v111_v18 }
  0x5c   :  { %462 = vmatprep.subr.mxu0 %v718_v0  ;;  %497 = vmatprep.subr.mxu1 %v718_v0 }
  0x5d   :  { %463 = vmatpush3.msra.mxu0 %v127_v19  ;;  %498 = vmatpush3.msra.mxu1 %v110_v20 }
  0x5e   :  { %464 = vmatprep.subr.mxu0 %v718_v0  ;;  %499 = vmatprep.subr.mxu1 %v718_v0 }
  0x5f   :  { %465 = vmatpush3.msra.mxu0 %v126_v21  ;;  %500 = vmatpush3.msra.mxu1 %v109_v22 }
  0x60   :  { %466 = vmatprep.subr.mxu0 %v718_v0  ;;  %501 = vmatprep.subr.mxu1 %v718_v0 }
  0x61   :  { %467 = vmatpush3.msra.mxu0 %v125_v23  ;;  %502 = vmatpush3.msra.mxu1 %v108_v24 }
  0x62   :  { %468 = vmatprep.subr.mxu0 %v718_v0  ;;  %503 = vmatprep.subr.mxu1 %v718_v0 }
  0x63   :  { %469 = vmatpush3.msra.mxu0 %v124_v25  ;;  %504 = vmatpush3.msra.mxu1 %v107_v26 }
  0x64   :  { %470 = vmatprep.subr.mxu0 %v718_v0  ;;  %505 = vmatprep.subr.mxu1 %v718_v0 }
  0x65   :  { %471 = vmatpush3.msra.mxu0 %v123_v27  ;;  %506 = vmatpush3.msra.mxu1 %v106_v28 }
  0x66   :  { %472 = vmatprep.subr.mxu0 %v718_v0  ;;  %507 = vmatprep.subr.mxu1 %v718_v0 }
  0x67   :  { %473 = vmatpush3.msra.mxu0 %v122_v29  ;;  %508 = vmatpush3.msra.mxu1 %v105_v30 }
  0x68   :  { %474 = vmatprep.subr.mxu0 %v718_v0  ;;  %509 = vmatprep.subr.mxu1 %v718_v0 }
  0x69   :  { %475 = vmatpush3.msra.mxu0 %v121_v31  ;;  %510 = vmatpush3.msra.mxu1 %v104_v32 }
  0x6a   :  { %477 = vmatmul.mubr.f32.vlgmr.msra.gmra.mxu0 %v120_v33  ;;  %514 = vmatprep.subr.mxu0 %v718_v0 }
  0x6b   :  { %512 = vmatmul.mubr.f32.vlgmr.msra.gmra.mxu1 %v103_v34  ;;  %515 = vmatpush3.msra.mxu0 %v293_v35 }
  0x6c   :  { %516 = vmatprep.subr.mxu0 %v718_v0  ;;  %546 = vmatprep.mubr.msk.f32.mxu0 %vm719_vm0, %v718_v0 }
  0x6d   :  { %517 = vmatpush3.msra.mxu0 %v292_v36 }
  0x6e   :  { %518 = vmatprep.subr.mxu0 %v718_v0 }
  0x6f   :  { %519 = vmatpush3.msra.mxu0 %v291_v37 }
  0x70   :  { %520 = vmatprep.subr.mxu0 %v718_v0 }
  0x71   :  { %521 = vmatpush3.msra.mxu0 %v290_v38 }
  0x72   :  { %522 = vmatprep.subr.mxu0 %v718_v0 }
  0x73   :  { %523 = vmatpush3.msra.mxu0 %v289_v39 }
  0x74   :  { %524 = vmatprep.subr.mxu0 %v718_v0 }
  0x75   :  { %525 = vmatpush3.msra.mxu0 %v288_v40 }
  0x76   :  { %526 = vmatprep.subr.mxu0 %v718_v0 }
  0x77   :  { %527 = vmatpush3.msra.mxu0 %v287_v41 }
  0x78   :  { %528 = vmatprep.subr.mxu0 %v718_v0 }
  0x79   :  { %529 = vmatpush3.msra.mxu0 %v286_v42 }
  0x7a   :  { %530 = vmatprep.subr.mxu0 %v718_v0 }
  0x7b   :  { %531 = vmatpush3.msra.mxu0 %v285_v43 }
  0x7c   :  { %532 = vmatprep.subr.mxu0 %v718_v0 }
  0x7d   :  { %533 = vmatpush3.msra.mxu0 %v284_v44 }
  0x7e   :  { %534 = vmatprep.subr.mxu0 %v718_v0 }
  0x7f   :  { %535 = vmatpush3.msra.mxu0 %v283_v45 }
  0x80   :  { %536 = vmatprep.subr.mxu0 %v718_v0 }
  0x81   :  { %537 = vmatpush3.msra.mxu0 %v282_v46 }
  0x82   :  { %538 = vmatprep.subr.mxu0 %v718_v0 }
  0x83   :  { %539 = vmatpush3.msra.mxu0 %v281_v47 }
  0x84   :  { %540 = vmatprep.subr.mxu0 %v718_v0 }
  0x85   :  { %541 = vmatpush3.msra.mxu0 %v280_v48 }
  0x86   :  { %542 = vmatprep.subr.mxu0 %v718_v0 }
  0x87   :  { %543 = vmatpush3.msra.mxu0 %v279_v49 }
  0x88   :  { %544 = vmatprep.subr.mxu0 %v718_v0 }
  0x89   :  { %545 = vmatpush3.msra.mxu0 %v278_v50 }
  0x8a   :  { %547 = vmatmul.mubr.f32.vlgmr.msra.gmra.mxu0 %v277_v51 }
 0x12a   :  { %v203_v52 = vpop.f32.mrf.mxu0 }
 0x12b   :  { %v273_v53 = vpop.f32.mrf.mxu1 }
 0x12c   :  { %v478_v54 = vpop.f32.mrf.mxu0  ;;  %v274_v56 = vadd.f32 %v273_v53, %v203_v52 }
 0x12d   :  { %v513_v55 = vpop.f32.mrf.mxu1 }
 0x14a   :  { %v360_v57 = vpop.f32.mrf.mxu0 }
 0x14b   :  { %v364_v59 = vadd.f32 %v360_v57, %v274_v56 }
 0x14c   :  { %v548_v60 = vpop.f32.mrf.mxu0 }
 0x14d   :  { %v372_v61 = vadd.f32 %v392_v58, %v364_v59 }
 0x14f   :  { %373 = vst [vmem:[#allocation13] sm:$0xff] %v372_v61 }
 0x150   :  { %691 = shalt.err (!%p688_p6)
}
 0x151   :  { %383 = dma.vmem_to_hbm [thread:$0]  %s381_s30, 128, %s855_s7, [#allocation4]  }
 0x152   :  { %708 = dma.done.wait [#allocation4], 128  }
 0x153   :  { %709 = vsyncadd [#allocation4], 4294967168 }
 0x154   :  { %387 = vsyncpa [#allocation3], 1 }
 0x155   :  { %388 = vsyncpa [#allocation6], 1 }
 0x156   :  { %389 = vsyncpa [#allocation9], 1 }
 0x157   :  { %390 = vsyncpa [#allocation12], 1 }
 0x158   :  { %391 = vsyncpa [#allocation4], 1 }

</bundles_post_ra>
